<compile_context>
chip_gen: v7x
topology: tpu7x:2x2x1
jax: 0.10.0
libtpu: 0.0.40
codegen_flags: <defaults>
</compile_context>

<pallas_src>
import jax
import jax.numpy as jnp
from jax.experimental import pallas as pl
from jax.experimental.pallas import tpu as pltpu

EPS = 1e-10
LANES = 128


def _iou_kernel(pred_ref, ann_ref, num_ref, den_ref):
    # pred_ref: (1, C, R, 128) f32   ann_ref: (1, R, 128) i32
    # num_ref / den_ref: (1, 1, 128) f32 resident accumulators (same output
    # block across the spatial grid axis).
    @pl.when(pl.program_id(1) == 0)
    def _():
        num_ref[...] = jnp.zeros_like(num_ref)
        den_ref[...] = jnp.zeros_like(den_ref)

    c = pred_ref.shape[1]
    a = ann_ref[0]                                   # (R, 128) int32 labels

    # Numerically-stable channel softmax pieces, one channel slab live at a
    # time (no (C, R, 128) temporaries).
    m = pred_ref[0, 0]
    for ch in range(1, c):
        m = jnp.maximum(m, pred_ref[0, ch])

    s = jnp.zeros_like(m)        # sum_ch exp(p_ch - m)
    g = jnp.zeros_like(m)        # exp(p_label - m)  (gathered via per-channel mask)
    for ch in range(c):
        e = jnp.exp(pred_ref[0, ch] - m)             # exp once per element
        s = s + e
        g = g + jnp.where(a == ch, e, 0.0)

    # 1/s: approximate reciprocal on the EUP slot + one Newton step on the VPU.
    inv_s = pl.reciprocal(s, approx=True)
    inv_s = inv_s * (2.0 - s * inv_s)

    sm_label = g * inv_s + EPS                       # (softmax + eps) at label channel
    sum_sm = s * inv_s + c * EPS                     # sum_ch (softmax + eps)

    hit = jnp.logical_and(a >= 0, a < c)             # label has a matching channel
    padf = (a >= 0).astype(jnp.float32)              # 0 on spatial padding (label = -1)

    # Per-pixel IoU terms (identical to the full one-hot formulation):
    #   num   = sum_ch pred*onehot                  = sm_label
    #   denom = sum_ch (pred + onehot - pred*onehot) = sum_sm + 1 - sm_label
    num_elem = jnp.where(hit, sm_label, 0.0)
    den_elem = (sum_sm + jnp.where(hit, 1.0 - sm_label, 0.0)) * padf

    # Only a sublane reduction per tile; lane reduction happens in the glue.
    num_ref[0] += jnp.sum(num_elem, axis=0, keepdims=True)
    den_ref[0] += jnp.sum(den_elem, axis=0, keepdims=True)


def iou_loss(pred, ann, *, block_rows=None):
    """pred: (b, c, h, w) float logits; ann: (b, h, w) integer labels. Returns (b,)."""
    b, c, h, w = pred.shape
    total = h * w
    rows = -(-total // LANES)

    # Spatial tile height (sublane rows per grid step): target ~2 MiB of pred
    # per step so double-buffered tiles fit comfortably on v5e/v6e/v7x.
    if block_rows is None:
        block_rows = (2 * 1024 * 1024) // (c * LANES * 4)
    block_rows = min(512, max(8, (block_rows // 8) * 8))
    if rows <= block_rows:
        r = rows                          # single spatial step: full-dim block
        rows_padded = rows
    else:
        r = block_rows                    # multiple of 8
        rows_padded = -(-rows // r) * r

    padded_total = rows_padded * LANES
    pred_f = pred.astype(jnp.float32).reshape(b, c, total)
    ann_i = ann.astype(jnp.int32).reshape(b, total)
    if padded_total > total:
        pad = padded_total - total
        pred_f = jnp.pad(pred_f, ((0, 0), (0, 0), (0, pad)))
        ann_i = jnp.pad(ann_i, ((0, 0), (0, pad)), constant_values=-1)
    pred_f = pred_f.reshape(b, c, rows_padded, LANES)   # lane-dense spatial layout
    ann_i = ann_i.reshape(b, rows_padded, LANES)

    grid = (b, rows_padded // r)

    num_out, den_out = pl.pallas_call(
        _iou_kernel,
        out_shape=(
            jax.ShapeDtypeStruct((b, 1, LANES), jnp.float32),
            jax.ShapeDtypeStruct((b, 1, LANES), jnp.float32),
        ),
        grid_spec=pltpu.PrefetchScalarGridSpec(
            num_scalar_prefetch=0,
            grid=grid,
            in_specs=[
                pl.BlockSpec((1, c, r, LANES), lambda i, j: (i, 0, j, 0)),
                pl.BlockSpec((1, r, LANES), lambda i, j: (i, j, 0)),
            ],
            out_specs=(
                pl.BlockSpec((1, 1, LANES), lambda i, j: (i, 0, 0)),
                pl.BlockSpec((1, 1, LANES), lambda i, j: (i, 0, 0)),
            ),
        ),
        compiler_params=pltpu.CompilerParams(
            dimension_semantics=("parallel", "arbitrary"),
            vmem_limit_bytes=32 * 1024 * 1024,
        ),
    )(pred_f, ann_i)

    # Tiny finalize in plain JAX: lane reduction, IoU, 1 - IoU.
    num = jnp.sum(num_out[:, 0, :], axis=-1)
    den = jnp.sum(den_out[:, 0, :], axis=-1)
    return 1.0 - num / den


def _iou_loss_ref(pred, ann):
    """Pure-JAX reference mirroring the PyTorch IoULoss module."""
    pred = jax.nn.softmax(pred, axis=1) + EPS
    b, c, h, w = pred.shape
    onehot = jax.nn.one_hot(ann.astype(jnp.int32), c, axis=1, dtype=jnp.float32)
    num = pred * onehot
    denom = pred + onehot - num
    num = jnp.sum(num, axis=(1, 2, 3))
    denom = jnp.sum(denom, axis=(1, 2, 3))
    iou = num / denom
    return 1.0 - iou


if __name__ == "__main__":
    key = jax.random.PRNGKey(0)
    k1, k2, k3, k4 = jax.random.split(key, 4)

    # Case 1: small NCHW shapes (single spatial tile).
    b, c, h, w = 2, 4, 16, 16
    pred = jax.random.normal(k1, (b, c, h, w), dtype=jnp.float32)
    ann = jax.random.randint(k2, (b, h, w), 0, c, dtype=jnp.int32)
    out = jax.block_until_ready(iou_loss(pred, ann))
    ref = _iou_loss_ref(pred, ann)
    assert out.shape == (b,)
    assert jnp.allclose(out, ref, rtol=1e-4, atol=1e-4), (out, ref)

    # Case 2: spatial size not a multiple of 128 (exercises padding) and a
    # forced small tile so the spatial grid axis takes several accumulation
    # steps (exercises the resident-accumulator / @pl.when init path).
    b2, c2, h2, w2 = 2, 5, 48, 48     # h*w = 2304 -> 18 rows -> 3 tiles of 8 rows
    pred2 = jax.random.normal(k3, (b2, c2, h2, w2), dtype=jnp.float32)
    ann2 = jax.random.randint(k4, (b2, h2, w2), 0, c2, dtype=jnp.int32)
    out2 = jax.block_until_ready(iou_loss(pred2, ann2, block_rows=8))
    ref2 = _iou_loss_ref(pred2, ann2)
    assert jnp.allclose(out2, ref2, rtol=1e-4, atol=1e-4), (out2, ref2)

    print("KERNEL_OK")
</pallas_src>

<mosaic_0001>
module attributes {stable_mosaic.version = 11 : i64} {
  func.func @_iou_kernel(%arg0: i32, %arg1: i32, %arg2: memref<1x4x2x128xf32, #tpu.memory_space<vmem>>, %arg3: memref<1x2x128xi32, #tpu.memory_space<vmem>>, %arg4: memref<1x1x128xf32, #tpu.memory_space<vmem>>, %arg5: memref<1x1x128xf32, #tpu.memory_space<vmem>>) attributes {dimension_semantics = [#tpu.dimension_semantics<parallel>, #tpu.dimension_semantics<arbitrary>], iteration_bounds = array<i64: 2, 1>, scalar_prefetch = 0 : i64, scratch_operands = 0 : i64, tpu.core_type = #tpu.core_type<tc>, window_params = [{transform_indices = @transform_0, window_bounds = array<i64: 1, 4, 2, 128>}, {transform_indices = @transform_1, window_bounds = array<i64: 1, 2, 128>}, {transform_indices = @transform_2, window_bounds = array<i64: 1, 1, 128>}, {transform_indices = @transform_3, window_bounds = array<i64: 1, 1, 128>}]} {
    %c0_i32 = arith.constant 0 : i32
    %0 = arith.cmpi eq, %arg1, %c0_i32 : i32
    %1 = arith.extui %0 : i1 to i32
    %c0_i32_0 = arith.constant 0 : i32
    %2 = arith.cmpi ne, %1, %c0_i32_0 : i32
    scf.if %2 {
      %cst_60 = arith.constant 0.000000e+00 : f32
      %102 = vector.broadcast %cst_60 : f32 to vector<1x1x128xf32>
      %c0_61 = arith.constant 0 : index
      %c0_62 = arith.constant 0 : index
      %c0_63 = arith.constant 0 : index
      %103 = vector.load %arg4[%c0_61, %c0_62, %c0_63] : memref<1x1x128xf32, #tpu.memory_space<vmem>>, vector<1x1x128xf32>
      tpu.vector_store %arg4[%c0_61, %c0_62, %c0_63], %102 {strides = array<i32>} : memref<1x1x128xf32, #tpu.memory_space<vmem>>, vector<1x1x128xf32>,
      %cst_64 = arith.constant 0.000000e+00 : f32
      %104 = vector.broadcast %cst_64 : f32 to vector<1x1x128xf32>
      %c0_65 = arith.constant 0 : index
      %c0_66 = arith.constant 0 : index
      %c0_67 = arith.constant 0 : index
      %105 = vector.load %arg5[%c0_65, %c0_66, %c0_67] : memref<1x1x128xf32, #tpu.memory_space<vmem>>, vector<1x1x128xf32>
      tpu.vector_store %arg5[%c0_65, %c0_66, %c0_67], %104 {strides = array<i32>} : memref<1x1x128xf32, #tpu.memory_space<vmem>>, vector<1x1x128xf32>,
    } else {
    }
    %c0 = arith.constant 0 : index
    %c0_1 = arith.constant 0 : index
    %c0_2 = arith.constant 0 : index
    %3 = vector.load %arg3[%c0, %c0_1, %c0_2] : memref<1x2x128xi32, #tpu.memory_space<vmem>>, vector<1x2x128xi32>
    %4 = vector.shape_cast %3 : vector<1x2x128xi32> to vector<2x128xi32>
    %c0_3 = arith.constant 0 : index
    %c0_4 = arith.constant 0 : index
    %c0_5 = arith.constant 0 : index
    %c0_6 = arith.constant 0 : index
    %5 = vector.load %arg2[%c0_3, %c0_4, %c0_5, %c0_6] : memref<1x4x2x128xf32, #tpu.memory_space<vmem>>, vector<1x1x2x128xf32>
    %6 = vector.shape_cast %5 : vector<1x1x2x128xf32> to vector<2x128xf32>
    %c0_7 = arith.constant 0 : index
    %c1 = arith.constant 1 : index
    %c0_8 = arith.constant 0 : index
    %c0_9 = arith.constant 0 : index
    %7 = vector.load %arg2[%c0_7, %c1, %c0_8, %c0_9] : memref<1x4x2x128xf32, #tpu.memory_space<vmem>>, vector<1x1x2x128xf32>
    %8 = vector.shape_cast %7 : vector<1x1x2x128xf32> to vector<2x128xf32>
    %9 = arith.maximumf %6, %8 : vector<2x128xf32>
    %c0_10 = arith.constant 0 : index
    %c2 = arith.constant 2 : index
    %c0_11 = arith.constant 0 : index
    %c0_12 = arith.constant 0 : index
    %10 = vector.load %arg2[%c0_10, %c2, %c0_11, %c0_12] : memref<1x4x2x128xf32, #tpu.memory_space<vmem>>, vector<1x1x2x128xf32>
    %11 = vector.shape_cast %10 : vector<1x1x2x128xf32> to vector<2x128xf32>
    %12 = arith.maximumf %9, %11 : vector<2x128xf32>
    %c0_13 = arith.constant 0 : index
    %c3 = arith.constant 3 : index
    %c0_14 = arith.constant 0 : index
    %c0_15 = arith.constant 0 : index
    %13 = vector.load %arg2[%c0_13, %c3, %c0_14, %c0_15] : memref<1x4x2x128xf32, #tpu.memory_space<vmem>>, vector<1x1x2x128xf32>
    %14 = vector.shape_cast %13 : vector<1x1x2x128xf32> to vector<2x128xf32>
    %15 = arith.maximumf %12, %14 : vector<2x128xf32>
    %cst = arith.constant 0.000000e+00 : f32
    %16 = vector.broadcast %cst : f32 to vector<2x128xf32>
    %cst_16 = arith.constant 0.000000e+00 : f32
    %17 = vector.broadcast %cst_16 : f32 to vector<2x128xf32>
    %c0_17 = arith.constant 0 : index
    %c0_18 = arith.constant 0 : index
    %c0_19 = arith.constant 0 : index
    %c0_20 = arith.constant 0 : index
    %18 = vector.load %arg2[%c0_17, %c0_18, %c0_19, %c0_20] : memref<1x4x2x128xf32, #tpu.memory_space<vmem>>, vector<1x1x2x128xf32>
    %19 = vector.shape_cast %18 : vector<1x1x2x128xf32> to vector<2x128xf32>
    %20 = arith.subf %19, %15 : vector<2x128xf32>
    %21 = math.exp %20 : vector<2x128xf32>
    %22 = arith.addf %16, %21 : vector<2x128xf32>
    %c0_i32_21 = arith.constant 0 : i32
    %23 = vector.broadcast %c0_i32_21 : i32 to vector<2x128xi32>
    %24 = arith.cmpi eq, %4, %23 : vector<2x128xi32>
    %cst_22 = arith.constant 0.000000e+00 : f32
    %25 = vector.broadcast %cst_22 : f32 to vector<2x128xf32>
    %26 = arith.select %24, %21, %25 : vector<2x128xi1>, vector<2x128xf32>
    %27 = arith.addf %17, %26 : vector<2x128xf32>
    %c0_23 = arith.constant 0 : index
    %c1_24 = arith.constant 1 : index
    %c0_25 = arith.constant 0 : index
    %c0_26 = arith.constant 0 : index
    %28 = vector.load %arg2[%c0_23, %c1_24, %c0_25, %c0_26] : memref<1x4x2x128xf32, #tpu.memory_space<vmem>>, vector<1x1x2x128xf32>
    %29 = vector.shape_cast %28 : vector<1x1x2x128xf32> to vector<2x128xf32>
    %30 = arith.subf %29, %15 : vector<2x128xf32>
    %31 = math.exp %30 : vector<2x128xf32>
    %32 = arith.addf %22, %31 : vector<2x128xf32>
    %c1_i32 = arith.constant 1 : i32
    %33 = vector.broadcast %c1_i32 : i32 to vector<2x128xi32>
    %34 = arith.cmpi eq, %4, %33 : vector<2x128xi32>
    %cst_27 = arith.constant 0.000000e+00 : f32
    %35 = vector.broadcast %cst_27 : f32 to vector<2x128xf32>
    %36 = arith.select %34, %31, %35 : vector<2x128xi1>, vector<2x128xf32>
    %37 = arith.addf %27, %36 : vector<2x128xf32>
    %c0_28 = arith.constant 0 : index
    %c2_29 = arith.constant 2 : index
    %c0_30 = arith.constant 0 : index
    %c0_31 = arith.constant 0 : index
    %38 = vector.load %arg2[%c0_28, %c2_29, %c0_30, %c0_31] : memref<1x4x2x128xf32, #tpu.memory_space<vmem>>, vector<1x1x2x128xf32>
    %39 = vector.shape_cast %38 : vector<1x1x2x128xf32> to vector<2x128xf32>
    %40 = arith.subf %39, %15 : vector<2x128xf32>
    %41 = math.exp %40 : vector<2x128xf32>
    %42 = arith.addf %32, %41 : vector<2x128xf32>
    %c2_i32 = arith.constant 2 : i32
    %43 = vector.broadcast %c2_i32 : i32 to vector<2x128xi32>
    %44 = arith.cmpi eq, %4, %43 : vector<2x128xi32>
    %cst_32 = arith.constant 0.000000e+00 : f32
    %45 = vector.broadcast %cst_32 : f32 to vector<2x128xf32>
    %46 = arith.select %44, %41, %45 : vector<2x128xi1>, vector<2x128xf32>
    %47 = arith.addf %37, %46 : vector<2x128xf32>
    %c0_33 = arith.constant 0 : index
    %c3_34 = arith.constant 3 : index
    %c0_35 = arith.constant 0 : index
    %c0_36 = arith.constant 0 : index
    %48 = vector.load %arg2[%c0_33, %c3_34, %c0_35, %c0_36] : memref<1x4x2x128xf32, #tpu.memory_space<vmem>>, vector<1x1x2x128xf32>
    %49 = vector.shape_cast %48 : vector<1x1x2x128xf32> to vector<2x128xf32>
    %50 = arith.subf %49, %15 : vector<2x128xf32>
    %51 = math.exp %50 : vector<2x128xf32>
    %52 = arith.addf %42, %51 : vector<2x128xf32>
    %c3_i32 = arith.constant 3 : i32
    %53 = vector.broadcast %c3_i32 : i32 to vector<2x128xi32>
    %54 = arith.cmpi eq, %4, %53 : vector<2x128xi32>
    %cst_37 = arith.constant 0.000000e+00 : f32
    %55 = vector.broadcast %cst_37 : f32 to vector<2x128xf32>
    %56 = arith.select %54, %51, %55 : vector<2x128xi1>, vector<2x128xf32>
    %57 = arith.addf %47, %56 : vector<2x128xf32>
    %58 = tpu.reciprocal %52 {approx = true} : vector<2x128xf32> -> vector<2x128xf32>
    %59 = arith.mulf %52, %58 : vector<2x128xf32>
    %cst_38 = arith.constant 2.000000e+00 : f32
    %60 = vector.broadcast %cst_38 : f32 to vector<2x128xf32>
    %61 = arith.subf %60, %59 : vector<2x128xf32>
    %62 = arith.mulf %58, %61 : vector<2x128xf32>
    %63 = arith.mulf %57, %62 : vector<2x128xf32>
    %cst_39 = arith.constant 1.000000e-10 : f32
    %64 = vector.broadcast %cst_39 : f32 to vector<2x128xf32>
    %65 = arith.addf %63, %64 : vector<2x128xf32>
    %66 = arith.mulf %52, %62 : vector<2x128xf32>
    %cst_40 = arith.constant 4.000000e-10 : f32
    %67 = vector.broadcast %cst_40 : f32 to vector<2x128xf32>
    %68 = arith.addf %66, %67 : vector<2x128xf32>
    %c0_i32_41 = arith.constant 0 : i32
    %69 = vector.broadcast %c0_i32_41 : i32 to vector<2x128xi32>
    %70 = arith.cmpi sge, %4, %69 : vector<2x128xi32>
    %c4_i32 = arith.constant 4 : i32
    %71 = vector.broadcast %c4_i32 : i32 to vector<2x128xi32>
    %72 = arith.cmpi slt, %4, %71 : vector<2x128xi32>
    %73 = arith.andi %70, %72 : vector<2x128xi1>
    %c0_i32_42 = arith.constant 0 : i32
    %74 = vector.broadcast %c0_i32_42 : i32 to vector<2x128xi32>
    %75 = arith.cmpi sge, %4, %74 : vector<2x128xi32>
    %76 = arith.extui %75 : vector<2x128xi1> to vector<2x128xi32>
    %77 = arith.sitofp %76 : vector<2x128xi32> to vector<2x128xf32>
    %cst_43 = arith.constant 0.000000e+00 : f32
    %78 = vector.broadcast %cst_43 : f32 to vector<2x128xf32>
    %79 = arith.select %73, %65, %78 : vector<2x128xi1>, vector<2x128xf32>
    %cst_44 = arith.constant 1.000000e+00 : f32
    %80 = vector.broadcast %cst_44 : f32 to vector<2x128xf32>
    %81 = arith.subf %80, %65 : vector<2x128xf32>
    %cst_45 = arith.constant 0.000000e+00 : f32
    %82 = vector.broadcast %cst_45 : f32 to vector<2x128xf32>
    %83 = arith.select %73, %81, %82 : vector<2x128xi1>, vector<2x128xf32>
    %84 = arith.addf %68, %83 : vector<2x128xf32>
    %85 = arith.mulf %84, %77 : vector<2x128xf32>
    %c0_46 = arith.constant 0 : index
    %c0_47 = arith.constant 0 : index
    %c0_48 = arith.constant 0 : index
    %86 = vector.load %arg4[%c0_46, %c0_47, %c0_48] : memref<1x1x128xf32, #tpu.memory_space<vmem>>, vector<1x1x128xf32>
    %87 = vector.shape_cast %86 : vector<1x1x128xf32> to vector<1x128xf32>
    %cst_49 = arith.constant dense<0.000000e+00> : vector<128xf32>
    %88 = vector.multi_reduction <add>, %79, %cst_49 [0] : vector<2x128xf32> to vector<128xf32>
    %89 = vector.shape_cast %88 : vector<128xf32> to vector<1x128xf32>
    %90 = arith.addf %87, %89 : vector<1x128xf32>
    %c0_50 = arith.constant 0 : index
    %c0_51 = arith.constant 0 : index
    %c0_52 = arith.constant 0 : index
    %91 = vector.load %arg4[%c0_50, %c0_51, %c0_52] : memref<1x1x128xf32, #tpu.memory_space<vmem>>, vector<1x1x128xf32>
    %92 = vector.shape_cast %91 : vector<1x1x128xf32> to vector<1x128xf32>
    %93 = vector.shape_cast %90 : vector<1x128xf32> to vector<1x1x128xf32>
    tpu.vector_store %arg4[%c0_50, %c0_51, %c0_52], %93 {strides = array<i32>} : memref<1x1x128xf32, #tpu.memory_space<vmem>>, vector<1x1x128xf32>,
    %c0_53 = arith.constant 0 : index
    %c0_54 = arith.constant 0 : index
    %c0_55 = arith.constant 0 : index
    %94 = vector.load %arg5[%c0_53, %c0_54, %c0_55] : memref<1x1x128xf32, #tpu.memory_space<vmem>>, vector<1x1x128xf32>
    %95 = vector.shape_cast %94 : vector<1x1x128xf32> to vector<1x128xf32>
    %cst_56 = arith.constant dense<0.000000e+00> : vector<128xf32>
    %96 = vector.multi_reduction <add>, %85, %cst_56 [0] : vector<2x128xf32> to vector<128xf32>
    %97 = vector.shape_cast %96 : vector<128xf32> to vector<1x128xf32>
    %98 = arith.addf %95, %97 : vector<1x128xf32>
    %c0_57 = arith.constant 0 : index
    %c0_58 = arith.constant 0 : index
    %c0_59 = arith.constant 0 : index
    %99 = vector.load %arg5[%c0_57, %c0_58, %c0_59] : memref<1x1x128xf32, #tpu.memory_space<vmem>>, vector<1x1x128xf32>
    %100 = vector.shape_cast %99 : vector<1x1x128xf32> to vector<1x128xf32>
    %101 = vector.shape_cast %98 : vector<1x128xf32> to vector<1x1x128xf32>
    tpu.vector_store %arg5[%c0_57, %c0_58, %c0_59], %101 {strides = array<i32>} : memref<1x1x128xf32, #tpu.memory_space<vmem>>, vector<1x1x128xf32>,
    return
  }
  func.func @transform_0(%arg0: i32, %arg1: i32) -> (i32, i32, i32, i32) {
    %c0_i32 = arith.constant 0 : i32
    %c0_i32_0 = arith.constant 0 : i32
    %c0_i32_1 = arith.constant 0 : i32
    return %arg0, %c0_i32, %arg1, %c0_i32_0 : i32, i32, i32, i32
  }
  func.func @transform_1(%arg0: i32, %arg1: i32) -> (i32, i32, i32) {
    %c0_i32 = arith.constant 0 : i32
    %c0_i32_0 = arith.constant 0 : i32
    return %arg0, %arg1, %c0_i32 : i32, i32, i32
  }
  func.func @transform_2(%arg0: i32, %arg1: i32) -> (i32, i32, i32) {
    %c0_i32 = arith.constant 0 : i32
    %c0_i32_0 = arith.constant 0 : i32
    %c0_i32_1 = arith.constant 0 : i32
    return %arg0, %c0_i32, %c0_i32_0 : i32, i32, i32
  }
  func.func @transform_3(%arg0: i32, %arg1: i32) -> (i32, i32, i32) {
    %c0_i32 = arith.constant 0 : i32
    %c0_i32_0 = arith.constant 0 : i32
    %c0_i32_1 = arith.constant 0 : i32
    return %arg0, %c0_i32, %c0_i32_0 : i32, i32, i32
  }
}

</mosaic_0001>

<bundles_post_ra>
// kernel: tpu_custom_call.1
= control target key start
LH: loop header
LB: loop body
LE: loop exit
PB: predicated region body
PF: predicated region fallthrough
CT: control target
= control target key end

     0   :  { %9 = vsyncpa [#allocation3], 0  ;;  %s1075_s0 = inlined_call_operand.hbm [shape: f32[2,4,2,128], index: 0, kind: input, shape index: {}]   ;;  %s1076_s1 = inlined_call_operand.hbm [shape: s32[2,2,128], index: 1, kind: input, shape index: {}]   ;;  %s1077_s2 = inlined_call_operand.hbm [shape: f32[2,1,128], index: 2, kind: output, shape index: {0}]   ;;  %s1078_s3 = inlined_call_operand.hbm [shape: f32[2,1,128], index: 3, kind: output, shape index: {1}]  }
   0x1   :  { %11 = vsyncpa [#allocation3 + $0x1], 0 }
   0x2   :  { %12 = vsyncpa [#allocation6], 0 }
   0x3   :  { %14 = vsyncpa [#allocation6 + $0x1], 0 }
   0x4   :  { %15 = vsyncpa [#allocation4], 0 }
   0x5   :  { %17 = vsyncpa [#allocation4 + $0x1], 0 }
   0x6   :  { %18 = vsyncpa [#allocation9], 0 }
   0x7   :  { %20 = vsyncpa [#allocation9 + $0x1], 0  ;;  %s808_s12 = smov 0   ;;  %s810_s13 = smov 0  }
   0x8   :  { %s812_s14 = smov 0   ;;  %s814_s15 = smov 0  }
   0x9   :  { %s816_s16 = smov 0   ;;  %s818_s17 = smov 0  }
   0xa LB: > { %s495_s18 = sadd.s32 4294967295, %s779_s17   ;;  %s496_s19 = sadd.s32 4294967294, %s779_s17   ;;  %s779_s17 = sphi %s818_s17, %s26_s17   ;;  %s775_s16 = sphi %s816_s16, %s1097_s16   ;;  %s771_s15 = sphi %s814_s15, %s1096_s15   ;;  %s767_s14 = sphi %s812_s14, %s1095_s14   ;;  %s763_s13 = sphi %s810_s13, %s1094_s13   ;;  %s759_s12 = sphi %s808_s12, %s1093_s12  }
   0xb   : > { %s38_s20 = sadd.s32 1, %s775_s16  ;;  %s47_s21 = sadd.s32 1, %s767_s14 }
   0xc   : > { %p40_p0 = scmp.ge.s32.totalorder %s38_s20, 2  ;;  %p54_p1 = scmp.ne.s32.totalorder %s767_s14, %s763_s13 }
   0xd   : > { %p55_p2 = scmp.eq.s32.totalorder %s779_s17, 0  ;;  %p60_p3 = scmp.ne.s32.totalorder %s763_s13, %s759_s12 }
   0xe   : > { %s1099_s20 = smov (%p40_p0, %s38_s20), 0  ;;  %p61_p5 = scmp.eq.s32.totalorder %s495_s18, 0 }
   0xf   : > { %p849_p4 = por %p55_p2, %p54_p1  ;;  %s42_s23 = ssub.s32 %s775_s16, %s1099_s20 }
  0x10   : > { %p112_p6 = scmp.eq.s32.totalorder %s495_s18, 1  ;;  %p45_p7 = scmp.eq.s32.totalorder %s42_s23, 0 }
  0x11   : > { %p855_p8 = por %p61_p5, %p60_p3  ;;  %p118_p10 = scmp.eq.s32.totalorder %s496_s19, 1 }
  0x12   : > { %p859_p9 = por %p112_p6, %p54_p1  ;;  %p538_p13 = scmp.lt.s32.totalorder %s779_s17, 2 }
  0x13   : > { %s1082_s24 = scalar_select %p855_p8, 1, 0 }
  0x14   : > { %s1083_s25 = scalar_select %p859_p9, 1, 0 }
  0x15   : > { %s864_s26 = scalar_select %p45_p7, %s767_s14, %s47_s21  }
  0x16   : > { %p866_p11 = por %p118_p10, %p60_p3  ;;  %s873_s28 = sand.u32 1, %s767_s14  }
  0x17   : > { %s499_s29 = sshll.u32 %s873_s28, 3  ;;  %s515_s30 = sshll.u32 %s775_s16, 7 }
  0x18   : > { %s1084_s27 = scalar_select %p866_p11, 1, 0 }
  0x19   : > { %s880_s6 = scalar_lea.hbm %s1075_s0, %s515_s30  ;;  %s168_s7 = scalar_lea.vmem [#allocation2], %s499_s29 }
  0x1a   : > { %s176_s8 = sshll.u32 %s168_s7, 4  ;;  %p886_p0 = pnand %p538_p13, %p849_p4  ;;  %s882_s8 = int_to_ptr.vmem [resolvable:$true] %s176_s8 }
  0x1b   : > { %s165_s10 = scalar_lea.sflag [#allocation3], %s873_s28  ;;  %s601_s11 = scalar_lea.hbm %s880_s6, 128 }
  0x1c   : > { %p602_p2 = scmp.ne.s32.totalorder %s880_s6, %s601_s11  ;;  %p603_p3 = pneg %p886_p0 }
  0x1d   : > { %s606_s21 = scalar_lea.hbm %s1075_s0, 256  ;;  %p607_p4 = scmp.lt.u32.totalorder %s880_s6, %s1075_s0 }
  0x1e   : > { %p604_p5 = pnand %p603_p3, %p602_p2  ;;  %p608_p7 = scmp.lt.u32.totalorder %s606_s21, %s601_s11 }
  0x1f   : > { %p610_p13 = scmp.lt.u32.totalorder %s601_s11, %s880_s6 }
  0x20   : > { %p605_p6 = pneg %p604_p5  ;;  %p609_p10 = por %p608_p7, %p607_p4 }
  0x22   : > { %p611_p12 = por %p610_p13, %p609_p10 }
  0x24   : > { %p612_p1 = pnand %p611_p12, %p605_p6 }
  0x26   : > { %615 = shalt.err (!%p612_p1)
}
  0x27   : > { %s616_s29 = scalar_lea.vmem %s882_s8, 128  ;;  %s781_s30 = smov [#allocation2]  }
  0x28   : > { %p617_p2 = scmp.ne.s32.totalorder %s882_s8, %s616_s29  ;;  %s621_s4 = sshll.u32 %s781_s30, 4  ;;  %s622_s4 = int_to_ptr.vmem [resolvable:$false] %s621_s4 }
  0x29   : > { %s623_s5 = scalar_lea.vmem %s622_s4, 256  ;;  %p624_p9 = scmp.lt.s32.totalorder %s882_s8, %s622_s4 }
  0x2a   : > { %p619_p5 = pnand %p617_p2, %p603_p3  ;;  %p625_p4 = scmp.lt.s32.totalorder %s623_s5, %s616_s29 }
  0x2c   : > { %p620_p11 = pneg %p619_p5  ;;  %p626_p7 = por %p625_p4, %p624_p9 }
  0x2e   : > { %p627_p10 = pnand %p626_p7, %p620_p11 }
  0x30   : > { %630 = shalt.err (!%p627_p10)
}
  0x31   : > { %s782_s7 = smov 32   ;;  %s783_s11 = smov 2  }
  0x32   : > { %527 = dma.hbm_to_vmem [thread:$0]  (!%p886_p0), %s880_s6, 128, %s882_s8, %s165_s10, %s782_s7, %s782_s7, %s783_s11  }
  0x33   : > { %p203_p12 = scmp.lt.s32.totalorder %s779_s17, 3  ;;  %s502_s18 = sshll.u32 %s873_s28, 1 }
  0x34   : > { %s503_s19 = sshll.u32 %s775_s16, 5  ;;  %p1086_p9 = scmp.ge.s32.totalorder %s779_s17, 1 }
  0x35   : > { %s931_s29 = scalar_lea.hbm %s1076_s1, %s503_s19  ;;  %s190_s30 = scalar_lea.vmem [#allocation5], %s502_s18 }
  0x36   : > { %p924_p11 = pnand %p1086_p9, %p203_p12  ;;  %s198_s4 = sshll.u32 %s190_s30, 4  ;;  %s199_s4 = int_to_ptr.vmem [resolvable:$true] %s198_s4 }
  0x37   : > { %s187_s6 = scalar_lea.sflag [#allocation6], %s873_s28  ;;  %s631_s8 = scalar_lea.hbm %s931_s29, 32 }
  0x38   : > { %s1087_s21 = scalar_select %p924_p11, 1, 0 }
  0x39   : > { %p632_p1 = scmp.ne.s32.totalorder %s931_s29, %s631_s8  ;;  %s636_s7 = scalar_lea.hbm %s1076_s1, 64 }
  0x3a   : > { %p637_p2 = scmp.lt.u32.totalorder %s931_s29, %s1076_s1  ;;  %p638_p5 = scmp.lt.u32.totalorder %s636_s7, %s631_s8 }
  0x3b   : > { %p634_p6 = pnand %p632_p1, %p603_p3  ;;  %p640_p7 = scmp.lt.u32.totalorder %s631_s8, %s931_s29 }
  0x3c   : > { %p639_p4 = por %p638_p5, %p637_p2 }
  0x3d   : > { %p635_p13 = pneg %p634_p6 }
  0x3e   : > { %p641_p10 = por %p640_p7, %p639_p4 }
  0x40   : > { %p642_p12 = pnand %p641_p10, %p635_p13 }
  0x42   : > { %645 = shalt.err (!%p642_p12)
}
  0x43   : > { %s646_s28 = scalar_lea.vmem %s199_s4, 32  ;;  %s784_s18 = smov [#allocation5]  }
  0x44   : > { %p647_p9 = scmp.ne.s32.totalorder %s199_s4, %s646_s28  ;;  %s651_s22 = sshll.u32 %s784_s18, 4  ;;  %s652_s22 = int_to_ptr.vmem [resolvable:$false] %s651_s22 }
  0x45   : > { %s653_s23 = scalar_lea.vmem %s652_s22, 64  ;;  %p654_p8 = scmp.lt.s32.totalorder %s199_s4, %s652_s22 }
  0x46   : > { %p649_p1 = pnand %p647_p9, %p603_p3  ;;  %p655_p11 = scmp.lt.s32.totalorder %s653_s23, %s646_s28 }
  0x48   : > { %p650_p6 = pneg %p649_p1  ;;  %p656_p2 = por %p655_p11, %p654_p8 }
  0x4a   : > { %p657_p5 = pnand %p656_p2, %p650_p6 }
  0x4c   : > { %660 = shalt.err (!%p657_p5)
}
  0x4d   : > { %530 = dma.hbm_to_vmem [thread:$0]  (!%p886_p0), %s931_s29, 32, %s199_s4, %s187_s6  }
  0x4e   : > { %p1088_p13 = scmp.ne.s32.totalorder %s1087_s21, 0 }
  0x4f   : > { %s956_s30 = sand.u32 (!%p1088_p13), 1, %s763_s13   ;;  %p1089_p3 = scmp.ne.s32.totalorder (!%p1088_p13), %s1082_s24, 0 }
  0x50   : > { %207 = sbr.rel (%p1088_p13) target bundleno = 195 (0xc3), region = 28  ;;  %s505_s8 = sshll.u32 (!%p1088_p13), %s956_s30, 3 }
  0x51   : > { %s210_s10 = scalar_lea.sflag (!%p1088_p13), [#allocation3], %s956_s30  ;;  %s213_s5 = scalar_lea.vmem (!%p1088_p13), [#allocation2], %s505_s8 }
  0x57   : > { %742 = dma.done.wait (%p1089_p3), %s210_s10, 128  }
  0x58   : > { %744 = vsyncadd (%p1089_p3), %s210_s10, 4294967168  ;;  %s506_s9 = sshll.u32 %s956_s30, 1  ;;  %s219_s21 = scalar_lea.sflag [#allocation6], %s956_s30 }
  0x59   : > { %s966_s29 = scalar_lea.vmem [#allocation5], %s506_s9 }
  0x5a   : > { %746 = dma.done.wait (%p1089_p3), %s219_s21, 32  }
  0x5b   : > { %748 = vsyncadd (%p1089_p3), %s219_s21, 4294967264  ;;  %s973_s4 = scalar_lea.vmem [#allocation7], %s956_s30  ;;  %v785_v0 = vmov 0.0   ;;  %s977_s6 = scalar_lea.vmem [#allocation8], %s956_s30  ;;  %v260_v1 = vld [vmem:[%s213_s5] sm:$0x3] }
  0x5c   : > { %257 = vst [vmem:[%s973_s4] sm:$0x1] %v785_v0  ;;  %258 = vst [vmem:[%s977_s6] sm:$0x1] %v785_v0  ;;  %v507_v2 = vld [vmem:[%s213_s5 + $0x2] sm:$0x3]  ;;  %v508_v4 = vld [vmem:[%s213_s5 + $0x4] sm:$0x3] }
  0x5d   : > { %v263_v3 = vmax.f32 %v260_v1, %v507_v2  ;;  %v509_v5 = vld [vmem:[%s213_s5 + $0x6] sm:$0x3]  ;;  %v259_v21 = vld [vmem:[%s966_s29] sm:$0x3]  ;;  %vm317_vm6 = vcmask 1041408   ;;  %s511_s24 = sshll.u32 %s771_s15, 4 }
  0x5e   : > { %vm274_vm0 = vcmp.eq.s32.totalorder %v259_v21, 0  ;;  %vm281_vm1 = vcmp.eq.s32.totalorder %v259_v21, 1  ;;  %vm288_vm2 = vcmp.eq.s32.totalorder %v259_v21, 2  ;;  %vm295_vm3 = vcmp.eq.s32.totalorder %v259_v21, 3  ;;  %s354_s7 = sshll.u32 %s973_s4, 4  ;;  %s989_s28 = scalar_lea.hbm %s1077_s2, %s511_s24  ;;  %s991_s7 = int_to_ptr.vmem [resolvable:$true] %s354_s7 }
  0x5f   : > { %v266_v6 = vmax.f32 %v263_v3, %v508_v4  ;;  %vm306_vm4 = vcmp.ge.s32.totalorder %v259_v21, 0  ;;  %vm307_vm5 = vcmp.lt.s32.totalorder %v259_v21, 4  ;;  %s367_s18 = sshll.u32 %s977_s6, 4  ;;  %s338_s22 = scalar_lea.sflag [#allocation4], %s956_s30  ;;  %s1027_s18 = int_to_ptr.vmem [resolvable:$true] %s367_s18 }
  0x60   : > { %vm308_vm7 = vmand %vm306_vm4, %vm307_vm5  ;;  %v510_v42 = vsel %vm306_vm4, 1.0, %v785_v0  ;;  %s661_s23 = scalar_lea.vmem %s991_s7, 16  ;;  %p1090_p0 = scmp.ne.s32.totalorder %s1083_s25, 0 }
  0x61   : > { %v269_v7 = vmax.f32 %v266_v6, %v509_v5  ;;  %p662_p8 = scmp.ne.s32.totalorder %s991_s7, %s661_s23  ;;  %s786_s8 = smov [#allocation7]  }
  0x62   : > { %s665_s10 = sshll.u32 %s786_s8, 4  ;;  %s666_s10 = int_to_ptr.vmem [resolvable:$false] %s665_s10 }
  0x63   : > { %v270_v8 = vsub.f32 %v260_v1, %v269_v7  ;;  %v277_v9 = vsub.f32 %v507_v2, %v269_v7  ;;  %v284_v10 = vsub.f32 %v508_v4, %v269_v7  ;;  %v291_v11 = vsub.f32 %v509_v5, %v269_v7  ;;  %v316_v54 = vld [vmem:[%s973_s4] sm:$0x1]  ;;  %p663_p11 = pnand %p662_p8, %p1090_p0  ;;  %s667_s5 = scalar_lea.vmem %s666_s10, 32 }
  0x64   : > { %v327_v60 = vld [vmem:[%s977_s6] sm:$0x1]  ;;  %p668_p7 = scmp.lt.s32.totalorder %s991_s7, %s666_s10  ;;  %p669_p10 = scmp.lt.s32.totalorder %s667_s5, %s661_s23 }
  0x65   : > { %v271_v12 = vmul.f32 1.442695, %v270_v8  ;;  %v278_v13 = vmul.f32 1.442695, %v277_v9  ;;  %v285_v14 = vmul.f32 1.442695, %v284_v10  ;;  %p664_p4 = pneg %p663_p11 }
  0x66   : > { %v292_v15 = vmul.f32 1.442695, %v291_v11  ;;  %p670_p12 = por %p669_p10, %p668_p7 }
  0x67   : > { %591 = vpow2.f32 %v271_v12 }
  0x68   : > { %593 = vpow2.f32 %v278_v13  ;;  %p671_p9 = pnand %p670_p12, %p664_p4 }
  0x69   : > { %595 = vpow2.f32 %v285_v14 }
  0x6a   : > { %597 = vpow2.f32 %v292_v15 }
  0x71   : > { %v592_v16 = vpop.eup %591 }
  0x72   : > { %v594_v17 = vpop.eup %593  ;;  %v275_v24 = vsel %vm274_vm0, %v592_v16, 0.0 }
  0x73   : > { %v596_v18 = vpop.eup %595  ;;  %v280_v19 = vadd.f32 %v594_v17, %v592_v16  ;;  %v282_v25 = vsel %vm281_vm1, %v594_v17, 0.0 }
  0x74   : > { %v598_v20 = vpop.eup %597  ;;  %v283_v26 = vadd.f32 %v282_v25, %v275_v24  ;;  %v289_v27 = vsel %vm288_vm2, %v596_v18, 0.0 }
  0x75   : > { %v287_v22 = vadd.f32 %v596_v18, %v280_v19  ;;  %v296_v30 = vsel %vm295_vm3, %v598_v20, 0.0 }
  0x76   : > { %v290_v28 = vadd.f32 %v289_v27, %v283_v26 }
  0x77   : > { %v294_v23 = vadd.f32 %v598_v20, %v287_v22 }
  0x78   : > { %v297_v32 = vadd.f32 %v296_v30, %v290_v28 }
  0x79   : > { %599 = vrcp.f32 %v294_v23 }
  0x83   : > { %v600_v29 = vpop.eup %599 }
  0x84   : > { %v299_v31 = vmul.f32 %v600_v29, %v294_v23 }
  0x86   : > { %v300_v33 = vsub.f32 2.0, %v299_v31 }
  0x88   : > { %v301_v34 = vmul.f32 %v600_v29, %v300_v33 }
  0x8a   : > { %v302_v35 = vmul.f32 %v301_v34, %v297_v32  ;;  %v304_v36 = vmul.f32 %v301_v34, %v294_v23 }
  0x8c   : > { %v303_v37 = vadd.f32 1e-10, %v302_v35  ;;  %v305_v38 = vadd.f32 4e-10, %v304_v36 }
  0x8e   : > { %v311_v39 = vsel %vm308_vm7, %v303_v37, 0.0  ;;  %v312_v40 = vsub.f32 1.0, %v303_v37 }
  0x8f   : > { %v318_v41 = vsel %vm317_vm6, %v311_v39, 0.0 }
  0x90   : > { %v313_v43 = vsel %vm308_vm7, %v312_v40, 0.0  ;;  %v319_v44 = vrot.slane %v318_v41, 4 }
  0x91   : > { %v314_v45 = vadd.f32 %v313_v43, %v305_v38 }
  0x92   : > { %v320_v46 = vadd.f32 %v319_v44, %v318_v41 }
  0x93   : > { %v315_v47 = vmul.f32 %v510_v42, %v314_v45 }
  0x94   : > { %v321_v48 = vrot.slane %v320_v46, 2 }
  0x95   : > { %v328_v49 = vsel %vm317_vm6, %v315_v47, 0.0 }
  0x96   : > { %v329_v50 = vrot.slane %v328_v49, 4  ;;  %v322_v51 = vadd.f32 %v321_v48, %v320_v46 }
  0x98   : > { %v330_v52 = vadd.f32 %v329_v50, %v328_v49  ;;  %v323_v53 = vrot.slane %v322_v51, 1 }
  0x9a   : > { %v331_v55 = vrot.slane %v330_v52, 2  ;;  %v324_v56 = vadd.f32 %v323_v53, %v322_v51 }
  0x9c   : > { %v332_v57 = vadd.f32 %v331_v55, %v330_v52  ;;  %v325_v58 = vadd.f32 %v324_v56, %v316_v54 }
  0x9e   : > { %326 = vst [vmem:[%s973_s4] sm:$0x1] %v325_v58  ;;  %v333_v59 = vrot.slane %v332_v57, 1 }
  0x9f   : > { %674 = shalt.err (!%p671_p9)
}
  0xa0   : > { %s675_s9 = scalar_lea.hbm %s989_s28, 16  ;;  %s679_s4 = scalar_lea.hbm %s1077_s2, 32 }
  0xa1   : > { %p676_p1 = scmp.ne.s32.totalorder %s989_s28, %s675_s9  ;;  %p680_p5 = scmp.lt.u32.totalorder %s989_s28, %s1077_s2 }
  0xa2   : > { %p681_p13 = scmp.lt.u32.totalorder %s679_s4, %s675_s9  ;;  %p683_p8 = scmp.lt.u32.totalorder %s675_s9, %s989_s28 }
  0xa3   : > { %p677_p6 = pnand %p676_p1, %p1090_p0 }
  0xa4   : > { %p682_p3 = por %p681_p13, %p680_p5 }
  0xa5   : > { %p678_p2 = pneg %p677_p6 }
  0xa6   : > { %p684_p11 = por %p683_p8, %p682_p3 }
  0xa8   : > { %p685_p4 = pnand %p684_p11, %p678_p2 }
  0xaa   : > { %688 = shalt.err (!%p685_p4)
}
  0xab   : > { %520 = dma.vmem_to_hbm [thread:$0]  (%p1090_p0), %s991_s7, 16, %s989_s28, %s338_s22   ;;  %v334_v61 = vadd.f32 %v333_v59, %v332_v57 }
  0xac   : > { %s1023_s10 = scalar_lea.hbm %s1078_s3, %s511_s24  ;;  %s342_s5 = scalar_lea.sflag [#allocation9], %s956_s30 }
  0xad   : > { %v335_v62 = vadd.f32 %v334_v61, %v327_v60  ;;  %s689_s9 = scalar_lea.vmem %s1027_s18, 16  ;;  %s787_s7 = smov [#allocation8]  }
  0xae   : > { %p690_p7 = scmp.ne.s32.totalorder %s1027_s18, %s689_s9  ;;  %s693_s15 = sshll.u32 %s787_s7, 4  ;;  %s694_s15 = int_to_ptr.vmem [resolvable:$false] %s693_s15 }
  0xaf   : > { %336 = vst [vmem:[%s977_s6] sm:$0x1] %v335_v62  ;;  %s695_s28 = scalar_lea.vmem %s694_s15, 32  ;;  %p696_p9 = scmp.lt.s32.totalorder %s1027_s18, %s694_s15 }
  0xb0   : > { %p691_p10 = pnand %p690_p7, %p1090_p0  ;;  %p697_p1 = scmp.lt.s32.totalorder %s695_s28, %s689_s9 }
  0xb2   : > { %p692_p12 = pneg %p691_p10  ;;  %p698_p6 = por %p697_p1, %p696_p9 }
  0xb4   : > { %p699_p2 = pnand %p698_p6, %p692_p12 }
  0xb6   : > { %702 = shalt.err (!%p699_p2)
}
  0xb7   : > { %s703_s30 = scalar_lea.hbm %s1023_s10, 16  ;;  %s707_s22 = scalar_lea.hbm %s1078_s3, 32 }
  0xb8   : > { %p704_p5 = scmp.ne.s32.totalorder %s1023_s10, %s703_s30  ;;  %p708_p8 = scmp.lt.u32.totalorder %s1023_s10, %s1078_s3 }
  0xb9   : > { %p709_p11 = scmp.lt.u32.totalorder %s707_s22, %s703_s30  ;;  %p711_p7 = scmp.lt.u32.totalorder %s703_s30, %s1023_s10 }
  0xba   : > { %p705_p13 = pnand %p704_p5, %p1090_p0 }
  0xbb   : > { %p710_p4 = por %p709_p11, %p708_p8 }
  0xbc   : > { %p706_p3 = pneg %p705_p13 }
  0xbd   : > { %p712_p10 = por %p711_p7, %p710_p4 }
  0xbf   : > { %p713_p12 = pnand %p712_p10, %p706_p3 }
  0xc1   : > { %716 = shalt.err (!%p713_p12)
}
  0xc2   : > { %521 = dma.vmem_to_hbm [thread:$0]  (%p1090_p0), %s1027_s18, 16, %s1023_s10, %s342_s5  }
  0xc3 PF: > { %s379_s4 = sand.u32 1, %s759_s12   ;;  %p1091_p9 = scmp.ne.s32.totalorder %s1084_s27, 0 }
  0xc4   : > { %p1092_p1 = scmp.ge.s32.totalorder %s779_s17, 2  ;;  %s380_s11 = scalar_lea.sflag [#allocation4], %s379_s4 }
  0xc6   : > { %p532_p6 = pnand %p1092_p1, %p1091_p9 }
  0xc8   : > { %750 = dma.done.wait (!%p532_p6), %s380_s11, 16  }
  0xc9   : > { %752 = vsyncadd (!%p532_p6), %s380_s11, 4294967280  ;;  %s388_s19 = scalar_lea.sflag [#allocation9], %s379_s4 }
  0xca   : > { %754 = dma.done.wait (!%p532_p6), %s388_s19, 16  }
  0xcb   : > { %756 = vsyncadd (!%p532_p6), %s388_s19, 4294967280  ;;  %s26_s17 = sadd.s32 1, %s779_s17   ;;  %s1093_s12 = smov %s763_s13 }
  0xcc   : > { %p23_p2 = scmp.ge.s32.totalorder %s26_s17, 4   ;;  %s1094_s13 = smov %s767_s14 }
  0xcd   : > { %s1095_s14 = smov %s864_s26  ;;  %s1096_s15 = smov %s775_s16 }
  0xce   : > { %s1097_s16 = smov %s1099_s20  ;;  %25 = sbr.rel (!%p23_p2) target bundleno = 10 (0xa), region = 110 }
  0xd5   :  { %392 = vsyncpa [#allocation3], 1 }
  0xd6   :  { %394 = vsyncpa [#allocation3 + $0x1], 1 }
  0xd7   :  { %395 = vsyncpa [#allocation6], 1 }
  0xd8   :  { %397 = vsyncpa [#allocation6 + $0x1], 1 }
  0xd9   :  { %398 = vsyncpa [#allocation4], 1 }
  0xda   :  { %400 = vsyncpa [#allocation4 + $0x1], 1 }
  0xdb   :  { %401 = vsyncpa [#allocation9], 1 }
  0xdc   :  { %403 = vsyncpa [#allocation9 + $0x1], 1 }

</bundles_post_ra>
